<compile_context>
chip_gen: v7x
topology: tpu7x:2x2x1
jax: 0.10.0
libtpu: 0.0.40
codegen_flags: <defaults>
</compile_context>

<pallas_src>
import functools

import jax
import jax.numpy as jnp
from jax.experimental import pallas as pl
from jax.experimental.pallas import tpu as pltpu

HIDDEN_SIZE = 128
INPUT_SIZE = 2 * 136     # 272
NUM_CLASSES = 2
NUM_LAYERS = 2           # hard-coded as two explicit layers


def _rnn_chunk_kernel(x_ref, wih0_ref, b0_ref, whh0_ref, wcat_ref, b1_ref,
                      out_ref, h1_ref, h2_ref, xp_ref, *, seq_len, chunk):
    """One time-chunk of the serial 2-layer tanh-RNN recurrence.

    x_ref   : (Tc, Bp, D)   raw input chunk (time-major)
    wih0_ref: (D, H)        W_ih0^T            (resident across grid steps)
    b0_ref  : (1, H)        b_ih0 + b_hh0
    whh0_ref: (H, H)        W_hh0^T
    wcat_ref: (2H, H)       [W_ih1^T ; W_hh1^T]
    b1_ref  : (1, H)        b_ih1 + b_hh1
    out_ref : (Bp, H)       last-timestep top-layer hidden state
    h1/h2_ref:(Bp, H)       recurrent state carried across grid steps (scratch)
    xp_ref  : (Tc, Bp, H)   per-chunk input projection (scratch)
    """
    t_chunk = pl.program_id(0)
    n_chunks = pl.num_programs(0)
    tc, bp, d = x_ref.shape
    h = out_ref.shape[1]

    @pl.when(t_chunk == 0)
    def _():
        h1_ref[...] = jnp.zeros_like(h1_ref)   # matches torch.zeros(num_layers, B, H)
        h2_ref[...] = jnp.zeros_like(h2_ref)

    # Layer-0 input projection for the whole chunk: one (Tc*Bp, D)x(D, H) MXU
    # pass, off the serial critical path; b_ih0 + b_hh0 folded in.
    x2 = x_ref[...].reshape(tc * bp, d)
    xp = jnp.dot(x2, wih0_ref[...], preferred_element_type=jnp.float32)
    xp_ref[...] = (xp + b0_ref[...]).reshape(tc, bp, h)

    # Loop-invariant broadcast hoisted (JAX does not CSE broadcast_in_dim).
    b1 = jnp.broadcast_to(b1_ref[...], (bp, h))

    # Number of valid timesteps in this (possibly ragged last) chunk.
    if seq_len % chunk == 0:
        n_valid = None
    else:
        n_valid = jnp.where(t_chunk == n_chunks - 1, seq_len % chunk, chunk)

    # TODO(synk): go weight-stationary on the MXU (pltpu.matmul_push_rhs /
    # matmul_acc_lhs / matmul_pop) so the 128-row RHS weights are pushed once
    # per kernel instead of once per step; kept jnp.dot for portability.
    def step(t, carry):
        h1, h2 = carry
        # Layer 0: recurrent matmul + precomputed input projection.
        h1_new = jnp.tanh(
            xp_ref[t]
            + jnp.dot(h1, whh0_ref[...], preferred_element_type=jnp.float32))
        # Layer 1: fused [h1_new, h2] @ [W_ih1^T ; W_hh1^T], K = 2H = 256.
        h_cat = jnp.concatenate([h1_new, h2], axis=-1)
        h2_new = jnp.tanh(
            jnp.dot(h_cat, wcat_ref[...], preferred_element_type=jnp.float32)
            + b1)
        if n_valid is not None:
            keep = t < n_valid
            h1_new = jnp.where(keep, h1_new, h1)
            h2_new = jnp.where(keep, h2_new, h2)
        return h1_new, h2_new

    # Unroll gives the scheduler cross-iteration visibility (layer-1 of step t
    # overlaps layer-0 of step t+1; both depend only on h1_t).
    unroll = True if chunk <= 32 else 4
    h1, h2 = jax.lax.fori_loop(0, chunk, step, (h1_ref[...], h2_ref[...]),
                               unroll=unroll)
    h1_ref[...] = h1
    h2_ref[...] = h2

    @pl.when(t_chunk == n_chunks - 1)
    def _():
        out_ref[...] = h2_ref[...]


@jax.jit
def rnn_model_forward(x, params):
    """x: (B, S, INPUT_SIZE) float32 -> (B, NUM_CLASSES) float32."""
    B, S, D = x.shape
    assert D == INPUT_SIZE
    (w_ih0, w_hh0, b_ih0, b_hh0,
     w_ih1, w_hh1, b_ih1, b_hh1,
     w_fc, b_fc) = params
    H = HIDDEN_SIZE

    # Pad batch to the f32 sublane multiple (8); padded rows sliced off below.
    Bp = ((B + 7) // 8) * 8
    if Bp != B:
        x = jnp.concatenate([x, jnp.zeros((Bp - B, S, D), x.dtype)], axis=0)

    # Time-major input so each grid step gets a contiguous (Tc, Bp, D) chunk.
    # TODO(synk): for very long S, transpose per chunk inside the kernel instead
    # to avoid this extra HBM pass over x.
    x_t = jnp.swapaxes(x, 0, 1)                                   # (S, Bp, D)

    # Weight prep (done once under jit): pre-transpose, fuse the layer-1 weight
    # pair into a single K=2H operand, pre-sum bias pairs.
    wih0_t = jnp.transpose(w_ih0)                                 # (D, H)
    whh0_t = jnp.transpose(w_hh0)                                 # (H, H)
    wcat = jnp.concatenate(
        [jnp.transpose(w_ih1), jnp.transpose(w_hh1)], axis=0)     # (2H, H)
    b0 = (b_ih0 + b_hh0)[None, :]                                 # (1, H)
    b1 = (b_ih1 + b_hh1)[None, :]                                 # (1, H)

    # Time-chunk size: whole sequence if short, else fixed chunks; the kernel
    # masks the ragged tail. Per-chunk VMEM ~ 2 x Tc*Bp*D*4 B (well under limits).
    Tc = S if S <= 256 else 128
    n_chunks = pl.cdiv(S, Tc)

    kernel = functools.partial(_rnn_chunk_kernel, seq_len=S, chunk=Tc)
    grid_spec = pltpu.PrefetchScalarGridSpec(
        num_scalar_prefetch=0,
        grid=(n_chunks,),
        in_specs=[
            pl.BlockSpec((Tc, Bp, D), lambda t: (t, 0, 0)),       # x chunk
            pl.BlockSpec((D, H), lambda t: (0, 0)),               # W_ih0^T
            pl.BlockSpec((1, H), lambda t: (0, 0)),               # b0
            pl.BlockSpec((H, H), lambda t: (0, 0)),               # W_hh0^T
            pl.BlockSpec((2 * H, H), lambda t: (0, 0)),           # [W_ih1^T; W_hh1^T]
            pl.BlockSpec((1, H), lambda t: (0, 0)),               # b1
        ],
        out_specs=pl.BlockSpec((Bp, H), lambda t: (0, 0)),
        scratch_shapes=[
            pltpu.VMEM((Bp, H), jnp.float32),         # h1 carry
            pltpu.VMEM((Bp, H), jnp.float32),         # h2 carry
            pltpu.VMEM((Tc, Bp, H), jnp.float32),     # per-chunk projection
        ],
    )
    h_last = pl.pallas_call(
        kernel,
        out_shape=jax.ShapeDtypeStruct((Bp, H), jnp.float32),
        grid_spec=grid_spec,
        compiler_params=pltpu.CompilerParams(
            dimension_semantics=("arbitrary",),   # serial recurrence over time
            vmem_limit_bytes=32 * 1024 * 1024),
    )(x_t, wih0_t, b0, whh0_t, wcat, b1)

    # Narrow (128 -> 2) classifier on the last timestep, kept lane-sparse work
    # outside the kernel.
    return h_last[:B] @ w_fc.T + b_fc


def init_params(key):
    """Deterministic init, PyTorch-style U(-1/sqrt(H), 1/sqrt(H))."""
    k = 1.0 / jnp.sqrt(jnp.float32(HIDDEN_SIZE))
    keys = jax.random.split(key, 10)
    u = lambda kk, shape: jax.random.uniform(kk, shape, jnp.float32, -k, k)
    w_ih0 = u(keys[0], (HIDDEN_SIZE, INPUT_SIZE))
    w_hh0 = u(keys[1], (HIDDEN_SIZE, HIDDEN_SIZE))
    b_ih0 = u(keys[2], (HIDDEN_SIZE,))
    b_hh0 = u(keys[3], (HIDDEN_SIZE,))
    w_ih1 = u(keys[4], (HIDDEN_SIZE, HIDDEN_SIZE))
    w_hh1 = u(keys[5], (HIDDEN_SIZE, HIDDEN_SIZE))
    b_ih1 = u(keys[6], (HIDDEN_SIZE,))
    b_hh1 = u(keys[7], (HIDDEN_SIZE,))
    w_fc = u(keys[8], (NUM_CLASSES, HIDDEN_SIZE))
    b_fc = u(keys[9], (NUM_CLASSES,))
    return (w_ih0, w_hh0, b_ih0, b_hh0,
            w_ih1, w_hh1, b_ih1, b_hh1,
            w_fc, b_fc)


def rnn_model_reference(x, params):
    """Pure-JAX reference mirroring torch nn.RNN + Linear."""
    (w_ih0, w_hh0, b_ih0, b_hh0,
     w_ih1, w_hh1, b_ih1, b_hh1,
     w_fc, b_fc) = params
    B, S, _ = x.shape
    h1 = jnp.zeros((B, HIDDEN_SIZE), jnp.float32)
    h2 = jnp.zeros((B, HIDDEN_SIZE), jnp.float32)

    def step(carry, x_t):
        h1, h2 = carry
        h1 = jnp.tanh(x_t @ w_ih0.T + b_ih0 + h1 @ w_hh0.T + b_hh0)
        h2 = jnp.tanh(h1 @ w_ih1.T + b_ih1 + h2 @ w_hh1.T + b_hh1)
        return (h1, h2), None

    (h1, h2), _ = jax.lax.scan(step, (h1, h2), jnp.transpose(x, (1, 0, 2)))
    return h2 @ w_fc.T + b_fc


if __name__ == "__main__":
    B, S = 2, 8
    key = jax.random.PRNGKey(0)
    kx, kp = jax.random.split(key)
    x = jax.random.normal(kx, (B, S, INPUT_SIZE), jnp.float32)
    params = init_params(kp)

    out = rnn_model_forward(x, params)
    out = jax.block_until_ready(out)

    ref = rnn_model_reference(x, params)
    assert out.shape == (B, NUM_CLASSES)
    assert jnp.allclose(out, ref, atol=1e-4, rtol=1e-4), (out, ref)
    print("KERNEL_OK")
</pallas_src>

<mosaic_0001>
module attributes {stable_mosaic.version = 11 : i64} {
  func.func @_rnn_chunk_kernel(%arg0: i32, %arg1: memref<8x8x272xf32, #tpu.memory_space<vmem>>, %arg2: memref<272x128xf32, #tpu.memory_space<vmem>>, %arg3: memref<1x128xf32, #tpu.memory_space<vmem>>, %arg4: memref<128x128xf32, #tpu.memory_space<vmem>>, %arg5: memref<256x128xf32, #tpu.memory_space<vmem>>, %arg6: memref<1x128xf32, #tpu.memory_space<vmem>>, %arg7: memref<8x128xf32, #tpu.memory_space<vmem>>, %arg8: memref<8x128xf32, #tpu.memory_space<vmem>>, %arg9: memref<8x128xf32, #tpu.memory_space<vmem>>, %arg10: memref<8x8x128xf32, #tpu.memory_space<vmem>>) attributes {dimension_semantics = [#tpu.dimension_semantics<arbitrary>], iteration_bounds = array<i64: 1>, scalar_prefetch = 0 : i64, scratch_operands = 3 : i64, tpu.core_type = #tpu.core_type<tc>, window_params = [{transform_indices = @transform_0, window_bounds = array<i64: 8, 8, 272>}, {pipeline_mode = #tpu.pipeline_mode<synchronous>, transform_indices = @transform_1, window_bounds = array<i64: 272, 128>}, {pipeline_mode = #tpu.pipeline_mode<synchronous>, transform_indices = @transform_2, window_bounds = array<i64: 1, 128>}, {pipeline_mode = #tpu.pipeline_mode<synchronous>, transform_indices = @transform_3, window_bounds = array<i64: 128, 128>}, {pipeline_mode = #tpu.pipeline_mode<synchronous>, transform_indices = @transform_4, window_bounds = array<i64: 256, 128>}, {pipeline_mode = #tpu.pipeline_mode<synchronous>, transform_indices = @transform_5, window_bounds = array<i64: 1, 128>}, {pipeline_mode = #tpu.pipeline_mode<synchronous>, transform_indices = @transform_6, window_bounds = array<i64: 8, 128>}]} {
    %c0_i32 = arith.constant 0 : i32
    %0 = arith.cmpi eq, %arg0, %c0_i32 : i32
    %1 = arith.extui %0 : i1 to i32
    %c0_i32_0 = arith.constant 0 : i32
    %2 = arith.cmpi ne, %1, %c0_i32_0 : i32
    scf.if %2 {
      %cst_87 = arith.constant 0.000000e+00 : f32
      %118 = vector.broadcast %cst_87 : f32 to vector<8x128xf32>
      %c0_88 = arith.constant 0 : index
      %c0_89 = arith.constant 0 : index
      %119 = vector.load %arg8[%c0_88, %c0_89] : memref<8x128xf32, #tpu.memory_space<vmem>>, vector<8x128xf32>
      tpu.vector_store %arg8[%c0_88, %c0_89], %118 {strides = array<i32>} : memref<8x128xf32, #tpu.memory_space<vmem>>, vector<8x128xf32>,
      %cst_90 = arith.constant 0.000000e+00 : f32
      %120 = vector.broadcast %cst_90 : f32 to vector<8x128xf32>
      %c0_91 = arith.constant 0 : index
      %c0_92 = arith.constant 0 : index
      %121 = vector.load %arg9[%c0_91, %c0_92] : memref<8x128xf32, #tpu.memory_space<vmem>>, vector<8x128xf32>
      tpu.vector_store %arg9[%c0_91, %c0_92], %120 {strides = array<i32>} : memref<8x128xf32, #tpu.memory_space<vmem>>, vector<8x128xf32>,
    } else {
    }
    %c0 = arith.constant 0 : index
    %c0_1 = arith.constant 0 : index
    %c0_2 = arith.constant 0 : index
    %3 = vector.load %arg1[%c0, %c0_1, %c0_2] : memref<8x8x272xf32, #tpu.memory_space<vmem>>, vector<8x8x272xf32>
    %4 = vector.shape_cast %3 : vector<8x8x272xf32> to vector<64x272xf32>
    %c0_3 = arith.constant 0 : index
    %c0_4 = arith.constant 0 : index
    %5 = vector.load %arg2[%c0_3, %c0_4] : memref<272x128xf32, #tpu.memory_space<vmem>>, vector<272x128xf32>
    %cst = arith.constant dense<0.000000e+00> : vector<64x128xf32>
    %6 = tpu.matmul %4, %5, %cst {dimension_numbers = #tpu.dot_dimension_numbers<[1], [0], [0], [1], [0, 0, 1, 1], [], []>} : vector<64x272xf32>, vector<272x128xf32>, vector<64x128xf32> -> vector<64x128xf32>
    %c0_5 = arith.constant 0 : index
    %c0_6 = arith.constant 0 : index
    %7 = vector.load %arg3[%c0_5, %c0_6] : memref<1x128xf32, #tpu.memory_space<vmem>>, vector<1x128xf32>
    %8 = vector.broadcast %7 : vector<1x128xf32> to vector<64x128xf32>
    %9 = arith.addf %6, %8 : vector<64x128xf32>
    %10 = vector.shape_cast %9 : vector<64x128xf32> to vector<8x8x128xf32>
    %c0_7 = arith.constant 0 : index
    %c0_8 = arith.constant 0 : index
    %c0_9 = arith.constant 0 : index
    %11 = vector.load %arg10[%c0_7, %c0_8, %c0_9] : memref<8x8x128xf32, #tpu.memory_space<vmem>>, vector<8x8x128xf32>
    tpu.vector_store %arg10[%c0_7, %c0_8, %c0_9], %10 {strides = array<i32>} : memref<8x8x128xf32, #tpu.memory_space<vmem>>, vector<8x8x128xf32>,
    %c0_10 = arith.constant 0 : index
    %c0_11 = arith.constant 0 : index
    %12 = vector.load %arg6[%c0_10, %c0_11] : memref<1x128xf32, #tpu.memory_space<vmem>>, vector<1x128xf32>
    %13 = vector.shape_cast %12 : vector<1x128xf32> to vector<1x128xf32>
    %14 = vector.broadcast %13 : vector<1x128xf32> to vector<8x128xf32>
    %c0_12 = arith.constant 0 : index
    %c0_13 = arith.constant 0 : index
    %15 = vector.load %arg8[%c0_12, %c0_13] : memref<8x128xf32, #tpu.memory_space<vmem>>, vector<8x128xf32>
    %c0_14 = arith.constant 0 : index
    %c0_15 = arith.constant 0 : index
    %16 = vector.load %arg9[%c0_14, %c0_15] : memref<8x128xf32, #tpu.memory_space<vmem>>, vector<8x128xf32>
    %c0_i32_16 = arith.constant 0 : i32
    %17 = arith.index_cast %c0_i32_16 : i32 to index
    %c0_17 = arith.constant 0 : index
    %c0_18 = arith.constant 0 : index
    %18 = vector.load %arg10[%17, %c0_17, %c0_18] : memref<8x8x128xf32, #tpu.memory_space<vmem>>, vector<1x8x128xf32>
    %19 = vector.shape_cast %18 : vector<1x8x128xf32> to vector<8x128xf32>
    %c0_19 = arith.constant 0 : index
    %c0_20 = arith.constant 0 : index
    %20 = vector.load %arg4[%c0_19, %c0_20] : memref<128x128xf32, #tpu.memory_space<vmem>>, vector<128x128xf32>
    %cst_21 = arith.constant dense<0.000000e+00> : vector<8x128xf32>
    %21 = tpu.matmul %15, %20, %cst_21 {dimension_numbers = #tpu.dot_dimension_numbers<[1], [0], [0], [1], [0, 0, 1, 1], [], []>} : vector<8x128xf32>, vector<128x128xf32>, vector<8x128xf32> -> vector<8x128xf32>
    %22 = arith.addf %19, %21 : vector<8x128xf32>
    %23 = math.tanh %22 : vector<8x128xf32>
    %24 = tpu.concatenate %23, %16 in 1 : vector<8x128xf32>, vector<8x128xf32> -> vector<8x256xf32>
    %c0_22 = arith.constant 0 : index
    %c0_23 = arith.constant 0 : index
    %25 = vector.load %arg5[%c0_22, %c0_23] : memref<256x128xf32, #tpu.memory_space<vmem>>, vector<256x128xf32>
    %cst_24 = arith.constant dense<0.000000e+00> : vector<8x128xf32>
    %26 = tpu.matmul %24, %25, %cst_24 {dimension_numbers = #tpu.dot_dimension_numbers<[1], [0], [0], [1], [0, 0, 1, 1], [], []>} : vector<8x256xf32>, vector<256x128xf32>, vector<8x128xf32> -> vector<8x128xf32>
    %27 = arith.addf %26, %14 : vector<8x128xf32>
    %28 = math.tanh %27 : vector<8x128xf32>
    %c1_i32 = arith.constant 1 : i32
    %29 = arith.index_cast %c1_i32 : i32 to index
    %c0_25 = arith.constant 0 : index
    %c0_26 = arith.constant 0 : index
    %30 = vector.load %arg10[%29, %c0_25, %c0_26] : memref<8x8x128xf32, #tpu.memory_space<vmem>>, vector<1x8x128xf32>
    %31 = vector.shape_cast %30 : vector<1x8x128xf32> to vector<8x128xf32>
    %c0_27 = arith.constant 0 : index
    %c0_28 = arith.constant 0 : index
    %32 = vector.load %arg4[%c0_27, %c0_28] : memref<128x128xf32, #tpu.memory_space<vmem>>, vector<128x128xf32>
    %cst_29 = arith.constant dense<0.000000e+00> : vector<8x128xf32>
    %33 = tpu.matmul %23, %32, %cst_29 {dimension_numbers = #tpu.dot_dimension_numbers<[1], [0], [0], [1], [0, 0, 1, 1], [], []>} : vector<8x128xf32>, vector<128x128xf32>, vector<8x128xf32> -> vector<8x128xf32>
    %34 = arith.addf %31, %33 : vector<8x128xf32>
    %35 = math.tanh %34 : vector<8x128xf32>
    %36 = tpu.concatenate %35, %28 in 1 : vector<8x128xf32>, vector<8x128xf32> -> vector<8x256xf32>
    %c0_30 = arith.constant 0 : index
    %c0_31 = arith.constant 0 : index
    %37 = vector.load %arg5[%c0_30, %c0_31] : memref<256x128xf32, #tpu.memory_space<vmem>>, vector<256x128xf32>
    %cst_32 = arith.constant dense<0.000000e+00> : vector<8x128xf32>
    %38 = tpu.matmul %36, %37, %cst_32 {dimension_numbers = #tpu.dot_dimension_numbers<[1], [0], [0], [1], [0, 0, 1, 1], [], []>} : vector<8x256xf32>, vector<256x128xf32>, vector<8x128xf32> -> vector<8x128xf32>
    %39 = arith.addf %38, %14 : vector<8x128xf32>
    %40 = math.tanh %39 : vector<8x128xf32>
    %c2_i32 = arith.constant 2 : i32
    %41 = arith.index_cast %c2_i32 : i32 to index
    %c0_33 = arith.constant 0 : index
    %c0_34 = arith.constant 0 : index
    %42 = vector.load %arg10[%41, %c0_33, %c0_34] : memref<8x8x128xf32, #tpu.memory_space<vmem>>, vector<1x8x128xf32>
    %43 = vector.shape_cast %42 : vector<1x8x128xf32> to vector<8x128xf32>
    %c0_35 = arith.constant 0 : index
    %c0_36 = arith.constant 0 : index
    %44 = vector.load %arg4[%c0_35, %c0_36] : memref<128x128xf32, #tpu.memory_space<vmem>>, vector<128x128xf32>
    %cst_37 = arith.constant dense<0.000000e+00> : vector<8x128xf32>
    %45 = tpu.matmul %35, %44, %cst_37 {dimension_numbers = #tpu.dot_dimension_numbers<[1], [0], [0], [1], [0, 0, 1, 1], [], []>} : vector<8x128xf32>, vector<128x128xf32>, vector<8x128xf32> -> vector<8x128xf32>
    %46 = arith.addf %43, %45 : vector<8x128xf32>
    %47 = math.tanh %46 : vector<8x128xf32>
    %48 = tpu.concatenate %47, %40 in 1 : vector<8x128xf32>, vector<8x128xf32> -> vector<8x256xf32>
    %c0_38 = arith.constant 0 : index
    %c0_39 = arith.constant 0 : index
    %49 = vector.load %arg5[%c0_38, %c0_39] : memref<256x128xf32, #tpu.memory_space<vmem>>, vector<256x128xf32>
    %cst_40 = arith.constant dense<0.000000e+00> : vector<8x128xf32>
    %50 = tpu.matmul %48, %49, %cst_40 {dimension_numbers = #tpu.dot_dimension_numbers<[1], [0], [0], [1], [0, 0, 1, 1], [], []>} : vector<8x256xf32>, vector<256x128xf32>, vector<8x128xf32> -> vector<8x128xf32>
    %51 = arith.addf %50, %14 : vector<8x128xf32>
    %52 = math.tanh %51 : vector<8x128xf32>
    %c3_i32 = arith.constant 3 : i32
    %53 = arith.index_cast %c3_i32 : i32 to index
    %c0_41 = arith.constant 0 : index
    %c0_42 = arith.constant 0 : index
    %54 = vector.load %arg10[%53, %c0_41, %c0_42] : memref<8x8x128xf32, #tpu.memory_space<vmem>>, vector<1x8x128xf32>
    %55 = vector.shape_cast %54 : vector<1x8x128xf32> to vector<8x128xf32>
    %c0_43 = arith.constant 0 : index
    %c0_44 = arith.constant 0 : index
    %56 = vector.load %arg4[%c0_43, %c0_44] : memref<128x128xf32, #tpu.memory_space<vmem>>, vector<128x128xf32>
    %cst_45 = arith.constant dense<0.000000e+00> : vector<8x128xf32>
    %57 = tpu.matmul %47, %56, %cst_45 {dimension_numbers = #tpu.dot_dimension_numbers<[1], [0], [0], [1], [0, 0, 1, 1], [], []>} : vector<8x128xf32>, vector<128x128xf32>, vector<8x128xf32> -> vector<8x128xf32>
    %58 = arith.addf %55, %57 : vector<8x128xf32>
    %59 = math.tanh %58 : vector<8x128xf32>
    %60 = tpu.concatenate %59, %52 in 1 : vector<8x128xf32>, vector<8x128xf32> -> vector<8x256xf32>
    %c0_46 = arith.constant 0 : index
    %c0_47 = arith.constant 0 : index
    %61 = vector.load %arg5[%c0_46, %c0_47] : memref<256x128xf32, #tpu.memory_space<vmem>>, vector<256x128xf32>
    %cst_48 = arith.constant dense<0.000000e+00> : vector<8x128xf32>
    %62 = tpu.matmul %60, %61, %cst_48 {dimension_numbers = #tpu.dot_dimension_numbers<[1], [0], [0], [1], [0, 0, 1, 1], [], []>} : vector<8x256xf32>, vector<256x128xf32>, vector<8x128xf32> -> vector<8x128xf32>
    %63 = arith.addf %62, %14 : vector<8x128xf32>
    %64 = math.tanh %63 : vector<8x128xf32>
    %c4_i32 = arith.constant 4 : i32
    %65 = arith.index_cast %c4_i32 : i32 to index
    %c0_49 = arith.constant 0 : index
    %c0_50 = arith.constant 0 : index
    %66 = vector.load %arg10[%65, %c0_49, %c0_50] : memref<8x8x128xf32, #tpu.memory_space<vmem>>, vector<1x8x128xf32>
    %67 = vector.shape_cast %66 : vector<1x8x128xf32> to vector<8x128xf32>
    %c0_51 = arith.constant 0 : index
    %c0_52 = arith.constant 0 : index
    %68 = vector.load %arg4[%c0_51, %c0_52] : memref<128x128xf32, #tpu.memory_space<vmem>>, vector<128x128xf32>
    %cst_53 = arith.constant dense<0.000000e+00> : vector<8x128xf32>
    %69 = tpu.matmul %59, %68, %cst_53 {dimension_numbers = #tpu.dot_dimension_numbers<[1], [0], [0], [1], [0, 0, 1, 1], [], []>} : vector<8x128xf32>, vector<128x128xf32>, vector<8x128xf32> -> vector<8x128xf32>
    %70 = arith.addf %67, %69 : vector<8x128xf32>
    %71 = math.tanh %70 : vector<8x128xf32>
    %72 = tpu.concatenate %71, %64 in 1 : vector<8x128xf32>, vector<8x128xf32> -> vector<8x256xf32>
    %c0_54 = arith.constant 0 : index
    %c0_55 = arith.constant 0 : index
    %73 = vector.load %arg5[%c0_54, %c0_55] : memref<256x128xf32, #tpu.memory_space<vmem>>, vector<256x128xf32>
    %cst_56 = arith.constant dense<0.000000e+00> : vector<8x128xf32>
    %74 = tpu.matmul %72, %73, %cst_56 {dimension_numbers = #tpu.dot_dimension_numbers<[1], [0], [0], [1], [0, 0, 1, 1], [], []>} : vector<8x256xf32>, vector<256x128xf32>, vector<8x128xf32> -> vector<8x128xf32>
    %75 = arith.addf %74, %14 : vector<8x128xf32>
    %76 = math.tanh %75 : vector<8x128xf32>
    %c5_i32 = arith.constant 5 : i32
    %77 = arith.index_cast %c5_i32 : i32 to index
    %c0_57 = arith.constant 0 : index
    %c0_58 = arith.constant 0 : index
    %78 = vector.load %arg10[%77, %c0_57, %c0_58] : memref<8x8x128xf32, #tpu.memory_space<vmem>>, vector<1x8x128xf32>
    %79 = vector.shape_cast %78 : vector<1x8x128xf32> to vector<8x128xf32>
    %c0_59 = arith.constant 0 : index
    %c0_60 = arith.constant 0 : index
    %80 = vector.load %arg4[%c0_59, %c0_60] : memref<128x128xf32, #tpu.memory_space<vmem>>, vector<128x128xf32>
    %cst_61 = arith.constant dense<0.000000e+00> : vector<8x128xf32>
    %81 = tpu.matmul %71, %80, %cst_61 {dimension_numbers = #tpu.dot_dimension_numbers<[1], [0], [0], [1], [0, 0, 1, 1], [], []>} : vector<8x128xf32>, vector<128x128xf32>, vector<8x128xf32> -> vector<8x128xf32>
    %82 = arith.addf %79, %81 : vector<8x128xf32>
    %83 = math.tanh %82 : vector<8x128xf32>
    %84 = tpu.concatenate %83, %76 in 1 : vector<8x128xf32>, vector<8x128xf32> -> vector<8x256xf32>
    %c0_62 = arith.constant 0 : index
    %c0_63 = arith.constant 0 : index
    %85 = vector.load %arg5[%c0_62, %c0_63] : memref<256x128xf32, #tpu.memory_space<vmem>>, vector<256x128xf32>
    %cst_64 = arith.constant dense<0.000000e+00> : vector<8x128xf32>
    %86 = tpu.matmul %84, %85, %cst_64 {dimension_numbers = #tpu.dot_dimension_numbers<[1], [0], [0], [1], [0, 0, 1, 1], [], []>} : vector<8x256xf32>, vector<256x128xf32>, vector<8x128xf32> -> vector<8x128xf32>
    %87 = arith.addf %86, %14 : vector<8x128xf32>
    %88 = math.tanh %87 : vector<8x128xf32>
    %c6_i32 = arith.constant 6 : i32
    %89 = arith.index_cast %c6_i32 : i32 to index
    %c0_65 = arith.constant 0 : index
    %c0_66 = arith.constant 0 : index
    %90 = vector.load %arg10[%89, %c0_65, %c0_66] : memref<8x8x128xf32, #tpu.memory_space<vmem>>, vector<1x8x128xf32>
    %91 = vector.shape_cast %90 : vector<1x8x128xf32> to vector<8x128xf32>
    %c0_67 = arith.constant 0 : index
    %c0_68 = arith.constant 0 : index
    %92 = vector.load %arg4[%c0_67, %c0_68] : memref<128x128xf32, #tpu.memory_space<vmem>>, vector<128x128xf32>
    %cst_69 = arith.constant dense<0.000000e+00> : vector<8x128xf32>
    %93 = tpu.matmul %83, %92, %cst_69 {dimension_numbers = #tpu.dot_dimension_numbers<[1], [0], [0], [1], [0, 0, 1, 1], [], []>} : vector<8x128xf32>, vector<128x128xf32>, vector<8x128xf32> -> vector<8x128xf32>
    %94 = arith.addf %91, %93 : vector<8x128xf32>
    %95 = math.tanh %94 : vector<8x128xf32>
    %96 = tpu.concatenate %95, %88 in 1 : vector<8x128xf32>, vector<8x128xf32> -> vector<8x256xf32>
    %c0_70 = arith.constant 0 : index
    %c0_71 = arith.constant 0 : index
    %97 = vector.load %arg5[%c0_70, %c0_71] : memref<256x128xf32, #tpu.memory_space<vmem>>, vector<256x128xf32>
    %cst_72 = arith.constant dense<0.000000e+00> : vector<8x128xf32>
    %98 = tpu.matmul %96, %97, %cst_72 {dimension_numbers = #tpu.dot_dimension_numbers<[1], [0], [0], [1], [0, 0, 1, 1], [], []>} : vector<8x256xf32>, vector<256x128xf32>, vector<8x128xf32> -> vector<8x128xf32>
    %99 = arith.addf %98, %14 : vector<8x128xf32>
    %100 = math.tanh %99 : vector<8x128xf32>
    %c7_i32 = arith.constant 7 : i32
    %101 = arith.index_cast %c7_i32 : i32 to index
    %c0_73 = arith.constant 0 : index
    %c0_74 = arith.constant 0 : index
    %102 = vector.load %arg10[%101, %c0_73, %c0_74] : memref<8x8x128xf32, #tpu.memory_space<vmem>>, vector<1x8x128xf32>
    %103 = vector.shape_cast %102 : vector<1x8x128xf32> to vector<8x128xf32>
    %c0_75 = arith.constant 0 : index
    %c0_76 = arith.constant 0 : index
    %104 = vector.load %arg4[%c0_75, %c0_76] : memref<128x128xf32, #tpu.memory_space<vmem>>, vector<128x128xf32>
    %cst_77 = arith.constant dense<0.000000e+00> : vector<8x128xf32>
    %105 = tpu.matmul %95, %104, %cst_77 {dimension_numbers = #tpu.dot_dimension_numbers<[1], [0], [0], [1], [0, 0, 1, 1], [], []>} : vector<8x128xf32>, vector<128x128xf32>, vector<8x128xf32> -> vector<8x128xf32>
    %106 = arith.addf %103, %105 : vector<8x128xf32>
    %107 = math.tanh %106 : vector<8x128xf32>
    %108 = tpu.concatenate %107, %100 in 1 : vector<8x128xf32>, vector<8x128xf32> -> vector<8x256xf32>
    %c0_78 = arith.constant 0 : index
    %c0_79 = arith.constant 0 : index
    %109 = vector.load %arg5[%c0_78, %c0_79] : memref<256x128xf32, #tpu.memory_space<vmem>>, vector<256x128xf32>
    %cst_80 = arith.constant dense<0.000000e+00> : vector<8x128xf32>
    %110 = tpu.matmul %108, %109, %cst_80 {dimension_numbers = #tpu.dot_dimension_numbers<[1], [0], [0], [1], [0, 0, 1, 1], [], []>} : vector<8x256xf32>, vector<256x128xf32>, vector<8x128xf32> -> vector<8x128xf32>
    %111 = arith.addf %110, %14 : vector<8x128xf32>
    %112 = math.tanh %111 : vector<8x128xf32>
    %c8_i32 = arith.constant 8 : i32
    %c0_81 = arith.constant 0 : index
    %c0_82 = arith.constant 0 : index
    %113 = vector.load %arg8[%c0_81, %c0_82] : memref<8x128xf32, #tpu.memory_space<vmem>>, vector<8x128xf32>
    tpu.vector_store %arg8[%c0_81, %c0_82], %107 {strides = array<i32>} : memref<8x128xf32, #tpu.memory_space<vmem>>, vector<8x128xf32>,
    %c0_83 = arith.constant 0 : index
    %c0_84 = arith.constant 0 : index
    %114 = vector.load %arg9[%c0_83, %c0_84] : memref<8x128xf32, #tpu.memory_space<vmem>>, vector<8x128xf32>
    tpu.vector_store %arg9[%c0_83, %c0_84], %112 {strides = array<i32>} : memref<8x128xf32, #tpu.memory_space<vmem>>, vector<8x128xf32>,
    %c0_i32_85 = arith.constant 0 : i32
    %115 = arith.cmpi eq, %arg0, %c0_i32_85 : i32
    %116 = arith.extui %115 : i1 to i32
    %c0_i32_86 = arith.constant 0 : i32
    %117 = arith.cmpi ne, %116, %c0_i32_86 : i32
    scf.if %117 {
      %c0_87 = arith.constant 0 : index
      %c0_88 = arith.constant 0 : index
      %118 = vector.load %arg9[%c0_87, %c0_88] : memref<8x128xf32, #tpu.memory_space<vmem>>, vector<8x128xf32>
      %c0_89 = arith.constant 0 : index
      %c0_90 = arith.constant 0 : index
      %119 = vector.load %arg7[%c0_89, %c0_90] : memref<8x128xf32, #tpu.memory_space<vmem>>, vector<8x128xf32>
      tpu.vector_store %arg7[%c0_89, %c0_90], %118 {strides = array<i32>} : memref<8x128xf32, #tpu.memory_space<vmem>>, vector<8x128xf32>,
    } else {
    }
    return
  }
  func.func @transform_0(%arg0: i32) -> (i32, i32, i32) {
    %c0_i32 = arith.constant 0 : i32
    %c0_i32_0 = arith.constant 0 : i32
    %c0_i32_1 = arith.constant 0 : i32
    return %arg0, %c0_i32, %c0_i32_0 : i32, i32, i32
  }
  func.func @transform_1(%arg0: i32) -> (i32, i32) {
    %c0_i32 = arith.constant 0 : i32
    %c0_i32_0 = arith.constant 0 : i32
    %c0_i32_1 = arith.constant 0 : i32
    return %c0_i32, %c0_i32_0 : i32, i32
  }
  func.func @transform_2(%arg0: i32) -> (i32, i32) {
    %c0_i32 = arith.constant 0 : i32
    %c0_i32_0 = arith.constant 0 : i32
    %c0_i32_1 = arith.constant 0 : i32
    return %c0_i32, %c0_i32_0 : i32, i32
  }
  func.func @transform_3(%arg0: i32) -> (i32, i32) {
    %c0_i32 = arith.constant 0 : i32
    %c0_i32_0 = arith.constant 0 : i32
    %c0_i32_1 = arith.constant 0 : i32
    return %c0_i32, %c0_i32_0 : i32, i32
  }
  func.func @transform_4(%arg0: i32) -> (i32, i32) {
    %c0_i32 = arith.constant 0 : i32
    %c0_i32_0 = arith.constant 0 : i32
    %c0_i32_1 = arith.constant 0 : i32
    return %c0_i32, %c0_i32_0 : i32, i32
  }
  func.func @transform_5(%arg0: i32) -> (i32, i32) {
    %c0_i32 = arith.constant 0 : i32
    %c0_i32_0 = arith.constant 0 : i32
    %c0_i32_1 = arith.constant 0 : i32
    return %c0_i32, %c0_i32_0 : i32, i32
  }
  func.func @transform_6(%arg0: i32) -> (i32, i32) {
    %c0_i32 = arith.constant 0 : i32
    %c0_i32_0 = arith.constant 0 : i32
    %c0_i32_1 = arith.constant 0 : i32
    return %c0_i32, %c0_i32_0 : i32, i32
  }
}

</mosaic_0001>

<bundles_post_ra>
// kernel: rnn_model_forward.1
= control target key start
LH: loop header
LB: loop body
LE: loop exit
PB: predicated region body
PF: predicated region fallthrough
CT: control target
= control target key end

     0   :  { %vm94_vm0 = vcmask 130048   ;;  %v2871_v24 = vmov 0.0|0.0   ;;  %vm2872_vm1 = vmmov 0   ;;  %s3600_s1 = inlined_call_operand.vmem [shape: f32[272,128], index: 1, kind: input, shape index: {}]   ;;  %s3601_s0 = inlined_call_operand.vmem [shape: f32[8,8,272], index: 0, kind: input, shape index: {}]   ;;  %s3602_s3 = inlined_call_operand.vmem [shape: f32[128,128], index: 3, kind: input, shape index: {}]   ;;  %s3603_s4 = inlined_call_operand.vmem [shape: f32[256,128], index: 4, kind: input, shape index: {}]   ;;  %s3604_s2 = inlined_call_operand.vmem [shape: f32[1,128], index: 2, kind: input, shape index: {}]   ;;  %s3605_s5 = inlined_call_operand.vmem [shape: f32[1,128], index: 5, kind: input, shape index: {}]   ;;  %s3606_s6 = inlined_call_operand.vmem [shape: f32[8,128], index: 6, kind: output, shape index: {}]  }
   0x1   :  { %v69_v0 = vld [vmem:[%s3600_s1 + $0x80] sm:$0xff]  ;;  %v70_v1 = vld [vmem:[%s3600_s1 + $0x88] sm:$0xff]  ;;  %v71_v9 = vld [vmem:[%s3600_s1 + $0x90] sm:$0xff] }
   0x2   :  { %v53_v2 = vld [vmem:[%s3600_s1] sm:$0xff]  ;;  %v2352_v3 = vpack.c.bf16 %v70_v1, %v69_v0  ;;  %v54_v4 = vld [vmem:[%s3600_s1 + $0x8] sm:$0xff]  ;;  %v72_v10 = vld [vmem:[%s3600_s1 + $0x98] sm:$0xff] }
   0x3   :  { %v85_v5 = vld [vmem:[%s3600_s1 + $0x100] sm:$0xff]  ;;  %v86_v6 = vld [vmem:[%s3600_s1 + $0x108] sm:$0xff]  ;;  %v2354_v7 = vpack.c.bf16 %v54_v4, %v53_v2  ;;  %v55_v11 = vld [vmem:[%s3600_s1 + $0x10] sm:$0xff]  ;;  %v2356_v12 = vpack.c.bf16 %v72_v10, %v71_v9 }
   0x4   :  { %v2384_v8 = vpack.c.bf16 %v86_v6, %v85_v5  ;;  %2353 = vmatprep.subr.bf16.mxu0 %v2352_v3  ;;  %v56_v13 = vld [vmem:[%s3600_s1 + $0x18] sm:$0xff]  ;;  %v31_v14 = vld [vmem:[%s3601_s0 + $0x10] sm:$0xff]  ;;  %v34_v15 = vld [vmem:[%s3601_s0 + $0x28] sm:$0xff] }
   0x5   :  { %2355 = vmatpush3.bf16.msra.mxu0 %v2354_v7  ;;  %v2358_v16 = vpack.c.bf16 %v56_v13, %v55_v11  ;;  %v347_v17 = vld [vmem:[%s3602_s3] sm:$0xff]  ;;  %v348_v18 = vld [vmem:[%s3602_s3 + $0x8] sm:$0xff]  ;;  %2060 = vmatprep.mubr.msk.f32.mxu1 %vm94_vm0, %v31_v14  ;;  %v349_v26 = vld [vmem:[%s3602_s3 + $0x10] sm:$0xff] }
   0x6   :  { %2385 = vmatprep.subr.bf16.mxu1 %v2384_v8  ;;  %v73_v19 = vld [vmem:[%s3600_s1 + $0xa0] sm:$0xff]  ;;  %2357 = vmatprep.subr.bf16.mxu0 %v2356_v12  ;;  %v2954_v20 = vpack.c.bf16 %v348_v18, %v347_v17  ;;  %v74_v21 = vld [vmem:[%s3600_s1 + $0xa8] sm:$0xff]  ;;  %v350_v27 = vld [vmem:[%s3602_s3 + $0x18] sm:$0xff] }
   0x7   :  { %2387 = vmatpush3.bf16.msra.mxu1 %v2384_v8  ;;  %v57_v22 = vld [vmem:[%s3600_s1 + $0x20] sm:$0xff]  ;;  %v58_v23 = vld [vmem:[%s3600_s1 + $0x28] sm:$0xff]  ;;  %v2360_v25 = vpack.c.bf16 %v74_v21, %v73_v19  ;;  %v75_v28 = vld [vmem:[%s3600_s1 + $0xb0] sm:$0xff]  ;;  %v2981_v31 = vpack.c.bf16 %v350_v27, %v349_v26 }
   0x8   :  { %2388 = vmatprep.subr.bf16.mxu1 %v2871_v24  ;;  %v76_v29 = vld [vmem:[%s3600_s1 + $0xb8] sm:$0xff]  ;;  %v2362_v30 = vpack.c.bf16 %v58_v23, %v57_v22  ;;  %v59_v33 = vld [vmem:[%s3600_s1 + $0x30] sm:$0xff]  ;;  %v351_v35 = vld [vmem:[%s3602_s3 + $0x20] sm:$0xff] }
   0x9   :  { %2359 = vmatpush3.bf16.msra.mxu0 %v2358_v16  ;;  %v2364_v32 = vpack.c.bf16 %v76_v29, %v75_v28  ;;  %v60_v34 = vld [vmem:[%s3600_s1 + $0x38] sm:$0xff]  ;;  %v352_v36 = vld [vmem:[%s3602_s3 + $0x28] sm:$0xff]  ;;  %v77_v37 = vld [vmem:[%s3600_s1 + $0xc0] sm:$0xff]  ;;  %v2873_v16 = vmov 0.0  }
   0xa   :  { %2061 = vmatmul.mubr.msk.f32.vlgmr.msra.gmra.mrb[0].mxu1 %vm94_vm0, %v34_v15  ;;  %2361 = vmatprep.subr.bf16.mxu0 %v2360_v25  ;;  %v78_v38 = vld [vmem:[%s3600_s1 + $0xc8] sm:$0xff]  ;;  %v2366_v39 = vpack.c.bf16 %v60_v34, %v59_v33  ;;  %v61_v40 = vld [vmem:[%s3600_s1 + $0x40] sm:$0xff]  ;;  %v3009_v42 = vpack.c.bf16 %v352_v36, %v351_v35  ;;  %v353_v44 = vld [vmem:[%s3602_s3 + $0x30] sm:$0xff] }
   0xb   :  { %2390 = vmatpush3.bf16.msra.mxu1 %v2954_v20  ;;  %v62_v41 = vld [vmem:[%s3600_s1 + $0x48] sm:$0xff]  ;;  %v2368_v43 = vpack.c.bf16 %v78_v38, %v77_v37  ;;  %v354_v45 = vld [vmem:[%s3602_s3 + $0x38] sm:$0xff]  ;;  %v79_v46 = vld [vmem:[%s3600_s1 + $0xd0] sm:$0xff] }
   0xc   :  { %2391 = vmatprep.subr.bf16.mxu1 %v2871_v24  ;;  %v80_v47 = vld [vmem:[%s3600_s1 + $0xd8] sm:$0xff]  ;;  %v37_v48 = vld [vmem:[%s3601_s0 + $0x40] sm:$0xff]  ;;  %v2370_v50 = vpack.c.bf16 %v62_v41, %v61_v40  ;;  %v63_v51 = vld [vmem:[%s3600_s1 + $0x50] sm:$0xff]  ;;  %v3042_v54 = vpack.c.bf16 %v354_v45, %v353_v44 }
   0xd   :  { %2363 = vmatpush3.bf16.msra.mxu0 %v2362_v30  ;;  %v40_v49 = vld [vmem:[%s3601_s0 + $0x58] sm:$0xff]  ;;  %2063 = vmatprep.mubr.msk.f32.mxu1 %vm94_vm0, %v37_v48  ;;  %v43_v53 = vld [vmem:[%s3601_s0 + $0x70] sm:$0xff]  ;;  %v2372_v55 = vpack.c.bf16 %v80_v47, %v79_v46  ;;  %v355_v56 = vld [vmem:[%s3602_s3 + $0x40] sm:$0xff] }
   0xe   :  { %2365 = vmatprep.subr.bf16.mxu0 %v2364_v32  ;;  %v64_v52 = vld [vmem:[%s3600_s1 + $0x58] sm:$0xff]  ;;  %2064 = vmatmul.mubr.msk.f32.gmra.mrb[2].mxu1 %vm94_vm0, %v40_v49  ;;  %v46_v57 = vld [vmem:[%s3601_s0 + $0x88] sm:$0xff]  ;;  %v81_v60 = vld [vmem:[%s3600_s1 + $0xe0] sm:$0xff] }
   0xf   :  { %2393 = vmatpush3.bf16.msra.mxu1 %v2981_v31  ;;  %v30_v58 = vld [vmem:[%s3601_s0 + $0x8] sm:$0xff]  ;;  %2066 = vmatprep.mubr.msk.f32.mxu1 %vm94_vm0, %v43_v53  ;;  %v49_v62 = vld [vmem:[%s3601_s0 + $0xa0] sm:$0xff]  ;;  %v2374_v63 = vpack.c.bf16 %v64_v52, %v63_v51  ;;  %v357_v4 = vld [vmem:[%s3602_s3 + $0x50] sm:$0xff] }
  0x10   :  { %2394 = vmatprep.subr.bf16.mxu1 %v2871_v24  ;;  %v356_v59 = vld [vmem:[%s3602_s3 + $0x48] sm:$0xff]  ;;  %183 = vmatprep.mubr.f32.mxu0 %v30_v58  ;;  %v65_v0 = vld [vmem:[%s3600_s1 + $0x60] sm:$0xff]  ;;  %v52_v5 = vld [vmem:[%s3601_s0 + $0xb8] sm:$0xff] }
  0x11   :  { %2367 = vmatpush3.bf16.msra.mxu0 %v2366_v39  ;;  %v82_v61 = vld [vmem:[%s3600_s1 + $0xe8] sm:$0xff]  ;;  %v3072_v1 = vpack.c.bf16 %v356_v59, %v355_v56  ;;  %v358_v6 = vld [vmem:[%s3602_s3 + $0x58] sm:$0xff]  ;;  %v83_v7 = vld [vmem:[%s3600_s1 + $0xf0] sm:$0xff] }
  0x12   :  { %2369 = vmatprep.subr.bf16.mxu0 %v2368_v43  ;;  %2067 = vmatmul.mubr.msk.f32.gmra.mrb[4].mxu1 %vm94_vm0, %v46_v57  ;;  %v2376_v2 = vpack.c.bf16 %v82_v61, %v81_v60  ;;  %v66_v3 = vld [vmem:[%s3600_s1 + $0x68] sm:$0xff]  ;;  %v84_v8 = vld [vmem:[%s3600_s1 + $0xf8] sm:$0xff]  ;;  %v3096_v10 = vpack.c.bf16 %v358_v6, %v357_v4  ;;  %v67_v12 = vld [vmem:[%s3600_s1 + $0x70] sm:$0xff] }
  0x13   :  { %2396 = vmatpush3.bf16.msra.mxu1 %v3009_v42  ;;  %2069 = vmatprep.mubr.msk.f32.mxu1 %vm94_vm0, %v49_v62  ;;  %v2378_v9 = vpack.c.bf16 %v66_v3, %v65_v0  ;;  %v2380_v11 = vpack.c.bf16 %v84_v8, %v83_v7  ;;  %v68_v13 = vld [vmem:[%s3600_s1 + $0x78] sm:$0xff]  ;;  %v359_v14 = vld [vmem:[%s3602_s3 + $0x60] sm:$0xff]  ;;  %v360_v15 = vld [vmem:[%s3602_s3 + $0x68] sm:$0xff] }
  0x14   :  { %2397 = vmatprep.subr.bf16.mxu1 %v2871_v24  ;;  %v2382_v17 = vpack.c.bf16 %v68_v13, %v67_v12  ;;  %v3114_v18 = vpack.c.bf16 %v360_v15, %v359_v14  ;;  %v361_v19 = vld [vmem:[%s3602_s3 + $0x70] sm:$0xff]  ;;  %v362_v21 = vld [vmem:[%s3602_s3 + $0x78] sm:$0xff]  ;;  %v29_v22 = vld [vmem:[%s3601_s0] sm:$0xff] }
  0x15   :  { %2371 = vmatpush3.bf16.msra.mxu0 %v2370_v50  ;;  %v33_v23 = vld [vmem:[%s3601_s0 + $0x20] sm:$0xff]  ;;  %v3130_v25 = vpack.c.bf16 %v362_v21, %v361_v19  ;;  %v32_v26 = vld [vmem:[%s3601_s0 + $0x18] sm:$0xff]  ;;  %v35_v28 = vld [vmem:[%s3601_s0 + $0x30] sm:$0xff] }
  0x16   :  { %2373 = vmatprep.subr.bf16.mxu0 %v2372_v55  ;;  %2070 = vmatmul.mubr.msk.f32.gmra.mrb[6].mxu1 %vm94_vm0, %v52_v5  ;;  %v36_v27 = vld [vmem:[%s3601_s0 + $0x38] sm:$0xff]  ;;  %v39_v29 = vld [vmem:[%s3601_s0 + $0x50] sm:$0xff]  ;;  %v38_v30 = vld [vmem:[%s3601_s0 + $0x48] sm:$0xff] }
  0x17   :  { %2399 = vmatpush3.bf16.msra.mxu1 %v3042_v54  ;;  %2104 = vmatprep.mubr.msk.f32.mxu1 %vm2872_vm1, %v2873_v16  ;;  %v42_v32 = vld [vmem:[%s3601_s0 + $0x68] sm:$0xff]  ;;  %v41_v33 = vld [vmem:[%s3601_s0 + $0x60] sm:$0xff]  ;;  %v44_v35 = vld [vmem:[%s3601_s0 + $0x78] sm:$0xff] }
  0x18   :  { %2400 = vmatprep.subr.bf16.mxu1 %v2871_v24  ;;  %v45_v34 = vld [vmem:[%s3601_s0 + $0x80] sm:$0xff]  ;;  %v48_v36 = vld [vmem:[%s3601_s0 + $0x98] sm:$0xff]  ;;  %v47_v37 = vld [vmem:[%s3601_s0 + $0x90] sm:$0xff] }
  0x19   :  { %2375 = vmatpush3.bf16.msra.mxu0 %v2374_v63  ;;  %v51_v38 = vld [vmem:[%s3601_s0 + $0xb0] sm:$0xff]  ;;  %v50_v39 = vld [vmem:[%s3601_s0 + $0xa8] sm:$0xff]  ;;  %v451_v40 = vld [vmem:[%s3603_s4 + $0x80] sm:$0xff] }
  0x1a   :  { %2377 = vmatprep.subr.bf16.mxu0 %v2376_v2  ;;  %v452_v41 = vld [vmem:[%s3603_s4 + $0x88] sm:$0xff]  ;;  %v435_v43 = vld [vmem:[%s3603_s4] sm:$0xff]  ;;  %v453_v46 = vld [vmem:[%s3603_s4 + $0x90] sm:$0xff] }
  0x1b   :  { %2402 = vmatpush3.bf16.msra.mxu1 %v3072_v1  ;;  %v3203_v44 = vpack.c.bf16 %v452_v41, %v451_v40  ;;  %v436_v45 = vld [vmem:[%s3603_s4 + $0x8] sm:$0xff]  ;;  %v454_v47 = vld [vmem:[%s3603_s4 + $0x98] sm:$0xff]  ;;  %v437_v50 = vld [vmem:[%s3603_s4 + $0x10] sm:$0xff] }
  0x1c   :  { %2403 = vmatprep.subr.bf16.mxu1 %v2871_v24  ;;  %v3214_v48 = vpack.c.bf16 %v436_v45, %v435_v43  ;;  %v3216_v49 = vpack.c.bf16 %v454_v47, %v453_v46  ;;  %v438_v51 = vld [vmem:[%s3603_s4 + $0x18] sm:$0xff]  ;;  %v455_v53 = vld [vmem:[%s3603_s4 + $0xa0] sm:$0xff]  ;;  %v456_v55 = vld [vmem:[%s3603_s4 + $0xa8] sm:$0xff] }
  0x1d   :  { %2379 = vmatpush3.bf16.msra.mxu0 %v2378_v9  ;;  %v3226_v52 = vpack.c.bf16 %v438_v51, %v437_v50  ;;  %v439_v56 = vld [vmem:[%s3603_s4 + $0x20] sm:$0xff]  ;;  %v3239_v57 = vpack.c.bf16 %v456_v55, %v455_v53  ;;  %v440_v58 = vld [vmem:[%s3603_s4 + $0x28] sm:$0xff]  ;;  %v457_v60 = vld [vmem:[%s3603_s4 + $0xb0] sm:$0xff] }
  0x1e   :  { %2381 = vmatprep.subr.bf16.mxu0 %v2380_v11  ;;  %v3244_v59 = vpack.c.bf16 %v440_v58, %v439_v56  ;;  %v458_v61 = vld [vmem:[%s3603_s4 + $0xb8] sm:$0xff]  ;;  %v441_v63 = vld [vmem:[%s3603_s4 + $0x30] sm:$0xff]  ;;  %v459_v3 = vld [vmem:[%s3603_s4 + $0xc0] sm:$0xff] }
  0x1f   :  { %2405 = vmatpush3.bf16.msra.mxu1 %v3096_v10  ;;  %v3254_v62 = vpack.c.bf16 %v458_v61, %v457_v60  ;;  %v442_v0 = vld [vmem:[%s3603_s4 + $0x38] sm:$0xff]  ;;  %v460_v4 = vld [vmem:[%s3603_s4 + $0xc8] sm:$0xff]  ;;  %v443_v6 = vld [vmem:[%s3603_s4 + $0x40] sm:$0xff] }
  0x20   :  { %2406 = vmatprep.subr.bf16.mxu1 %v2871_v24  ;;  %v3262_v2 = vpack.c.bf16 %v442_v0, %v441_v63  ;;  %v3272_v5 = vpack.c.bf16 %v460_v4, %v459_v3  ;;  %v444_v7 = vld [vmem:[%s3603_s4 + $0x48] sm:$0xff]  ;;  %v461_v9 = vld [vmem:[%s3603_s4 + $0xd0] sm:$0xff]  ;;  %v462_v11 = vld [vmem:[%s3603_s4 + $0xd8] sm:$0xff] }
  0x21   :  { %2383 = vmatpush3.bf16.msra.mxu0 %v2382_v17  ;;  %v3280_v8 = vpack.c.bf16 %v444_v7, %v443_v6  ;;  %v3290_v12 = vpack.c.bf16 %v462_v11, %v461_v9  ;;  %v445_v13 = vld [vmem:[%s3603_s4 + $0x50] sm:$0xff]  ;;  %v446_v14 = vld [vmem:[%s3603_s4 + $0x58] sm:$0xff]  ;;  %v463_v17 = vld [vmem:[%s3603_s4 + $0xe0] sm:$0xff] }
  0x22   :  { %2413 = vmatprep.subr.bf16.mxu0 %v3203_v44  ;;  %v3298_v15 = vpack.c.bf16 %v446_v14, %v445_v13  ;;  %v464_v19 = vld [vmem:[%s3603_s4 + $0xe8] sm:$0xff]  ;;  %v1564_v45 = vld [vmem:[%s3604_s2] ss:$0 sm:$0xff] }
  0x23   :  { %2408 = vmatpush3.bf16.msra.mxu1 %v3114_v18  ;;  %v3308_v21 = vpack.c.bf16 %v464_v19, %v463_v17 }
  0x24   :  { %2409 = vmatprep.subr.bf16.mxu1 %v2871_v24  ;;  %184 = vmatmul.mubr.f32.vlgmr.msra.gmra.mrb[0].mxu0 %v29_v22  ;;  %v447_v22 = vld [vmem:[%s3603_s4 + $0x60] sm:$0xff] }
  0x25   :  { %188 = vmatprep.mubr.f32.mxu0 %v33_v23  ;;  %2415 = vmatpush3.bf16.msra.mxu0 %v3214_v48  ;;  %v448_v23 = vld [vmem:[%s3603_s4 + $0x68] sm:$0xff] }
  0x26   :  { %2417 = vmatprep.subr.bf16.mxu0 %v3216_v49 }
  0x27   :  { %2411 = vmatpush3.bf16.msra.mxu1 %v3130_v25 }
  0x28   :  { %2444 = vmatprep.subr.bf16.mxu1 %v2871_v24  ;;  %189 = vmatmul.mubr.f32.gmra.mrb[2].mxu0 %v32_v26  ;;  %v3316_v26 = vpack.c.bf16 %v448_v23, %v447_v22 }
  0x29   :  { %193 = vmatprep.mubr.f32.mxu0 %v36_v27  ;;  %2419 = vmatpush3.bf16.msra.mxu0 %v3226_v52  ;;  %v465_v27 = vld [vmem:[%s3603_s4 + $0xf0] sm:$0xff] }
  0x2a   :  { %2105 = vmatmul.mubr.f32.vlgmr.msra.gmra.mrb[8].mxu1 %v2873_v16  ;;  %2421 = vmatprep.subr.bf16.mxu0 %v3239_v57 }
  0x2b   :  { %2446 = vmatpush3.bf16.msra.mxu1 %v2954_v20  ;;  %2139 = vmatprep.mubr.msk.f32.mxu1 %vm2872_vm1, %v2873_v16 }
  0x2c   :  { %2447 = vmatprep.subr.bf16.mxu1 %v2871_v24  ;;  %194 = vmatmul.mubr.f32.gmra.mrb[4].mxu0 %v35_v28  ;;  %v466_v28 = vld [vmem:[%s3603_s4 + $0xf8] sm:$0xff] }
  0x2d   :  { %198 = vmatprep.mubr.f32.mxu0 %v39_v29  ;;  %2423 = vmatpush3.bf16.msra.mxu0 %v3244_v59  ;;  %v3326_v29 = vpack.c.bf16 %v466_v28, %v465_v27 }
  0x2e   :  { %2425 = vmatprep.subr.bf16.mxu0 %v3254_v62 }
  0x2f   :  { %2449 = vmatpush3.bf16.msra.mxu1 %v2981_v31 }
  0x30   :  { %2450 = vmatprep.subr.bf16.mxu1 %v2871_v24  ;;  %199 = vmatmul.mubr.f32.gmra.mrb[6].mxu0 %v38_v30  ;;  %v449_v30 = vld [vmem:[%s3603_s4 + $0x70] sm:$0xff] }
  0x31   :  { %203 = vmatprep.mubr.f32.mxu0 %v42_v32  ;;  %2427 = vmatpush3.bf16.msra.mxu0 %v3262_v2  ;;  %v450_v32 = vld [vmem:[%s3603_s4 + $0x78] sm:$0xff] }
  0x32   :  { %2429 = vmatprep.subr.bf16.mxu0 %v3272_v5 }
  0x33   :  { %2452 = vmatpush3.bf16.msra.mxu1 %v3009_v42 }
  0x34   :  { %2453 = vmatprep.subr.bf16.mxu1 %v2871_v24  ;;  %204 = vmatmul.mubr.f32.gmra.mrb[8].mxu0 %v41_v33  ;;  %v3334_v33 = vpack.c.bf16 %v450_v32, %v449_v30 }
  0x35   :  { %208 = vmatprep.mubr.f32.mxu0 %v45_v34  ;;  %2431 = vmatpush3.bf16.msra.mxu0 %v3280_v8 }
  0x36   :  { %2433 = vmatprep.subr.bf16.mxu0 %v3290_v12 }
  0x37   :  { %2455 = vmatpush3.bf16.msra.mxu1 %v3042_v54 }
  0x38   :  { %2456 = vmatprep.subr.bf16.mxu1 %v2871_v24  ;;  %209 = vmatmul.mubr.f32.gmra.mrb[10].mxu0 %v44_v35 }
  0x39   :  { %213 = vmatprep.mubr.f32.mxu0 %v48_v36  ;;  %2435 = vmatpush3.bf16.msra.mxu0 %v3298_v15 }
  0x3a   :  { %2437 = vmatprep.subr.bf16.mxu0 %v3308_v21 }
  0x3b   :  { %2458 = vmatpush3.bf16.msra.mxu1 %v3072_v1 }
  0x3c   :  { %2459 = vmatprep.subr.bf16.mxu1 %v2871_v24  ;;  %214 = vmatmul.mubr.f32.gmra.mrb[12].mxu0 %v47_v37 }
  0x3d   :  { %218 = vmatprep.mubr.f32.mxu0 %v51_v38  ;;  %2439 = vmatpush3.bf16.msra.mxu0 %v3316_v26 }
  0x3e   :  { %2441 = vmatprep.subr.bf16.mxu0 %v3326_v29 }
  0x3f   :  { %2461 = vmatpush3.bf16.msra.mxu1 %v3096_v10 }
  0x40   :  { %2462 = vmatprep.subr.bf16.mxu1 %v2871_v24  ;;  %219 = vmatmul.mubr.f32.gmra.mrb[14].mxu0 %v50_v39 }
  0x41   :  { %531 = vmatprep.mubr.f32.mxu0 %v2873_v16  ;;  %2443 = vmatpush3.bf16.msra.mxu0 %v3334_v33 }
  0x42   :  { %2469 = vmatprep.subr.bf16.mxu0 %v3203_v44 }
  0x43   :  { %2464 = vmatpush3.bf16.msra.mxu1 %v3114_v18 }
  0x44   :  { %2465 = vmatprep.subr.bf16.mxu1 %v2871_v24 }
  0x47   :  { %2467 = vmatpush3.bf16.msra.mxu1 %v3130_v25 }
  0x48   :  { %2500 = vmatprep.subr.bf16.mxu1 %v2871_v24 }
  0xdd   :  { %v2062_v34 = vpop.f32.mrb[0].mxu1 }
  0xde   :  { %v290_v35 = vpop.f32.mrb[1].mxu1 }
  0xe1   :  { %v2065_v36 = vpop.f32.mrb[2].mxu1 }
  0xe2   :  { %v300_v37 = vpop.f32.mrb[3].mxu1 }
  0xe5   :  { %v2068_v38 = vpop.f32.mrb[4].mxu1 }
  0xe6   :  { %v310_v39 = vpop.f32.mrb[5].mxu1 }
  0xe9   :  { %v3339_v40 = vpop.f32.mrb[6].mxu1 }
  0xea   :  { %v320_v41 = vpop.f32.mrb[7].mxu1 }
  0xf7   :  { %v1606_v43 = vpop.f32.mrb[0].mxu0 }
  0xf8   :  { %v1607_v46 = vpop.f32.mrb[1].mxu0 }
  0xf9   :  { %v1608_v47 = vadd.f32 %v1607_v46, %v1606_v43 }
  0xfb   :  { %v186_v50 = vadd.f32 %v1608_v47, %v1564_v45  ;;  %v1609_v51 = vpop.f32.mrb[2].mxu0 }
  0xfc   :  { %v1610_v53 = vpop.f32.mrb[3].mxu0 }
  0xfd   :  { %v429_v55 = vpop.f32.mrb[8].mxu1  ;;  %v1611_v56 = vadd.f32 %v1610_v53, %v1609_v51  ;;  %v291_v58 = vadd.f32 %v290_v35, %v186_v50 }
  0xfe   :  { %v2106_v60 = vpop.f32.mrb[9].mxu1 }
  0xff   :  { %v191_v61 = vadd.f32 %v1611_v56, %v1564_v45  ;;  %v433_v63 = vadd.f32 %v429_v55, %v291_v58  ;;  %v1612_v0 = vpop.f32.mrb[4].mxu0  ;;  %v3397_v60 = vld [vmem:[%s3605_s5] ss:$0 sm:$0xff] }
 0x100   :  { %v1613_v3 = vpop.f32.mrb[5].mxu0 }
 0x101   :  { %2839 = vtanh.f32 %v433_v63  ;;  %v1614_v4 = vadd.f32 %v1613_v3, %v1612_v0  ;;  %v3344_v6 = vadd.f32 %v2062_v34, %v191_v61 }
 0x103   :  { %v196_v7 = vadd.f32 %v1614_v4, %v1564_v45  ;;  %v1615_v9 = vpop.f32.mrb[6].mxu0 }
 0x104   :  { %v1616_v11 = vpop.f32.mrb[7].mxu0 }
 0x105   :  { %v1617_v13 = vadd.f32 %v1616_v11, %v1615_v9  ;;  %v3346_v14 = vadd.f32 %v300_v37, %v196_v7 }
 0x107   :  { %v201_v17 = vadd.f32 %v1617_v13, %v1564_v45  ;;  %v1618_v19 = vpop.f32.mrb[8].mxu0 }
 0x108   :  { %v1619_v22 = vpop.f32.mrb[9].mxu0 }
 0x109   :  { %v1620_v23 = vadd.f32 %v1619_v22, %v1618_v19  ;;  %v3348_v27 = vadd.f32 %v2065_v36, %v201_v17 }
 0x10b   :  { %v2840_v28 = vpop.eup %2839  ;;  %v206_v30 = vadd.f32 %v1620_v23, %v1564_v45  ;;  %v1621_v32 = vpop.f32.mrb[10].mxu0 }
 0x10c   :  { %v1622_v35 = vpop.f32.mrb[11].mxu0  ;;  %532 = vmatmul.mubr.f32.vlgmr.msra.gmra.mrb[16].mxu0 %v2840_v28  ;;  %2140 = vmatmul.mubr.f32.vlgmr.msra.gmra.mrb[10].mxu1 %v2840_v28 }
 0x10d   :  { %v1623_v34 = vadd.f32 %v1622_v35, %v1621_v32  ;;  %2502 = vmatpush3.bf16.msra.mxu1 %v2954_v20  ;;  %2471 = vmatpush3.bf16.msra.mxu0 %v3214_v48  ;;  %v3352_v43 = vadd.f32 %v310_v39, %v206_v30 }
 0x10e   :  { %2503 = vmatprep.subr.bf16.mxu1 %v2871_v24  ;;  %2473 = vmatprep.subr.bf16.mxu0 %v3216_v49 }
 0x10f   :  { %v211_v37 = vadd.f32 %v1623_v34, %v1564_v45  ;;  %v1624_v36 = vpop.f32.mrb[12].mxu0  ;;  %2174 = vmatprep.mubr.msk.f32.mxu1 %vm2872_vm1, %v2873_v16 }
 0x110   :  { %v1625_v46 = vpop.f32.mrb[13].mxu0 }
 0x111   :  { %v1626_v47 = vadd.f32 %v1625_v46, %v1624_v36  ;;  %2505 = vmatpush3.bf16.msra.mxu1 %v2981_v31  ;;  %2475 = vmatpush3.bf16.msra.mxu0 %v3226_v52  ;;  %v3360_v50 = vadd.f32 %v2068_v38, %v211_v37 }
 0x112   :  { %2506 = vmatprep.subr.bf16.mxu1 %v2871_v24  ;;  %2477 = vmatprep.subr.bf16.mxu0 %v3239_v57 }
 0x113   :  { %v216_v39 = vadd.f32 %v1626_v47, %v1564_v45  ;;  %v1627_v51 = vpop.f32.mrb[14].mxu0 }
 0x114   :  { %v1628_v53 = vpop.f32.mrb[15].mxu0 }
 0x115   :  { %v1629_v55 = vadd.f32 %v1628_v53, %v1627_v51  ;;  %2508 = vmatpush3.bf16.msra.mxu1 %v3009_v42  ;;  %2479 = vmatpush3.bf16.msra.mxu0 %v3244_v59  ;;  %v3366_v56 = vadd.f32 %v320_v41, %v216_v39 }
 0x116   :  { %2509 = vmatprep.subr.bf16.mxu1 %v2871_v24  ;;  %2481 = vmatprep.subr.bf16.mxu0 %v3254_v62 }
 0x117   :  { %v221_v38 = vadd.f32 %v1629_v55, %v1564_v45 }
 0x119   :  { %2511 = vmatpush3.bf16.msra.mxu1 %v3042_v54  ;;  %2483 = vmatpush3.bf16.msra.mxu0 %v3262_v2  ;;  %v3373_v58 = vadd.f32 %v3339_v40, %v221_v38 }
 0x11a   :  { %2512 = vmatprep.subr.bf16.mxu1 %v2871_v24  ;;  %2485 = vmatprep.subr.bf16.mxu0 %v3272_v5 }
 0x11d   :  { %2514 = vmatpush3.bf16.msra.mxu1 %v3072_v1  ;;  %2487 = vmatpush3.bf16.msra.mxu0 %v3280_v8 }
 0x11e   :  { %2515 = vmatprep.subr.bf16.mxu1 %v2871_v24  ;;  %2489 = vmatprep.subr.bf16.mxu0 %v3290_v12 }
 0x121   :  { %2517 = vmatpush3.bf16.msra.mxu1 %v3096_v10  ;;  %2491 = vmatpush3.bf16.msra.mxu0 %v3298_v15 }
 0x122   :  { %2518 = vmatprep.subr.bf16.mxu1 %v2871_v24  ;;  %2493 = vmatprep.subr.bf16.mxu0 %v3308_v21 }
 0x125   :  { %2520 = vmatpush3.bf16.msra.mxu1 %v3114_v18  ;;  %2495 = vmatpush3.bf16.msra.mxu0 %v3316_v26 }
 0x126   :  { %2521 = vmatprep.subr.bf16.mxu1 %v2871_v24  ;;  %2497 = vmatprep.subr.bf16.mxu0 %v3326_v29 }
 0x129   :  { %2523 = vmatpush3.bf16.msra.mxu1 %v3130_v25  ;;  %2499 = vmatpush3.bf16.msra.mxu0 %v3334_v33 }
 0x12a   :  { %2556 = vmatprep.subr.bf16.mxu1 %v2871_v24  ;;  %2525 = vmatprep.subr.bf16.mxu0 %v3203_v44 }
 0x1df   :  { %v1689_v40 = vpop.f32.mrb[16].mxu0  ;;  %v606_v41 = vpop.f32.mrb[10].mxu1 }
 0x1e0   :  { %v610_v45 = vadd.f32 %v606_v41, %v3344_v6  ;;  %v1690_v61 = vpop.f32.mrb[17].mxu0  ;;  %v2141_v63 = vpop.f32.mrb[11].mxu1 }
 0x1e1   :  { %v1691_v0 = vadd.f32 %v1690_v61, %v1689_v40 }
 0x1e2   :  { %2841 = vtanh.f32 %v610_v45 }
 0x1e3   :  { %v534_v3 = vadd.f32 %v1691_v0, %v3397_v60 }
 0x1e5   :  { %2843 = vtanh.f32 %v534_v3 }
 0x1ec   :  { %v2842_v4 = vpop.eup %2841 }
 0x1ed   :  { %2175 = vmatmul.mubr.f32.vlgmr.msra.gmra.mrb[12].mxu1 %v2842_v4 }
 0x1ee   :  { %2558 = vmatpush3.bf16.msra.mxu1 %v2954_v20  ;;  %2209 = vmatprep.mubr.msk.f32.mxu1 %vm2872_vm1, %v2873_v16 }
 0x1ef   :  { %v2844_v6 = vpop.eup %2843  ;;  %2559 = vmatprep.subr.bf16.mxu1 %v2871_v24 }
 0x1f0   :  { %676 = vmatprep.mubr.f32.mxu0 %v2844_v6 }
 0x1f1   :  { %677 = vmatmul.mubr.f32.vlgmr.msra.gmra.mrb[18].mxu0 %v2842_v4 }
 0x1f2   :  { %2561 = vmatpush3.bf16.msra.mxu1 %v2981_v31  ;;  %2527 = vmatpush3.bf16.msra.mxu0 %v3214_v48 }
 0x1f3   :  { %2562 = vmatprep.subr.bf16.mxu1 %v2871_v24  ;;  %2529 = vmatprep.subr.bf16.mxu0 %v3216_v49 }
 0x1f6   :  { %2564 = vmatpush3.bf16.msra.mxu1 %v3009_v42  ;;  %2531 = vmatpush3.bf16.msra.mxu0 %v3226_v52 }
 0x1f7   :  { %2565 = vmatprep.subr.bf16.mxu1 %v2871_v24  ;;  %2533 = vmatprep.subr.bf16.mxu0 %v3239_v57 }
 0x1fa   :  { %2567 = vmatpush3.bf16.msra.mxu1 %v3042_v54  ;;  %2535 = vmatpush3.bf16.msra.mxu0 %v3244_v59 }
 0x1fb   :  { %2568 = vmatprep.subr.bf16.mxu1 %v2871_v24  ;;  %2537 = vmatprep.subr.bf16.mxu0 %v3254_v62 }
 0x1fe   :  { %2570 = vmatpush3.bf16.msra.mxu1 %v3072_v1  ;;  %2539 = vmatpush3.bf16.msra.mxu0 %v3262_v2 }
 0x1ff   :  { %2571 = vmatprep.subr.bf16.mxu1 %v2871_v24  ;;  %2541 = vmatprep.subr.bf16.mxu0 %v3272_v5 }
 0x202   :  { %2573 = vmatpush3.bf16.msra.mxu1 %v3096_v10  ;;  %2543 = vmatpush3.bf16.msra.mxu0 %v3280_v8 }
 0x203   :  { %2574 = vmatprep.subr.bf16.mxu1 %v2871_v24  ;;  %2545 = vmatprep.subr.bf16.mxu0 %v3290_v12 }
 0x206   :  { %2576 = vmatpush3.bf16.msra.mxu1 %v3114_v18  ;;  %2547 = vmatpush3.bf16.msra.mxu0 %v3298_v15 }
 0x207   :  { %2577 = vmatprep.subr.bf16.mxu1 %v2871_v24  ;;  %2549 = vmatprep.subr.bf16.mxu0 %v3308_v21 }
 0x20a   :  { %2579 = vmatpush3.bf16.msra.mxu1 %v3130_v25  ;;  %2551 = vmatpush3.bf16.msra.mxu0 %v3316_v26 }
 0x20b   :  { %2553 = vmatprep.subr.bf16.mxu0 %v3326_v29  ;;  %2612 = vmatprep.subr.bf16.mxu1 %v2871_v24 }
 0x20e   :  { %2555 = vmatpush3.bf16.msra.mxu0 %v3334_v33 }
 0x20f   :  { %2581 = vmatprep.subr.bf16.mxu0 %v3203_v44 }
 0x2c0   :  { %v751_v7 = vpop.f32.mrb[12].mxu1 }
 0x2c1   :  { %v755_v9 = vadd.f32 %v751_v7, %v3346_v14  ;;  %v2176_v11 = vpop.f32.mrb[13].mxu1 }
 0x2c3   :  { %2845 = vtanh.f32 %v755_v9 }
 0x2c4   :  { %v1741_v13 = vpop.f32.mrb[18].mxu0 }
 0x2c5   :  { %v1742_v17 = vpop.f32.mrb[19].mxu0 }
 0x2c6   :  { %v1743_v19 = vadd.f32 %v1742_v17, %v1741_v13 }
 0x2c8   :  { %v679_v22 = vadd.f32 %v1743_v19, %v3397_v60 }
 0x2ca   :  { %2847 = vtanh.f32 %v679_v22 }
 0x2cd   :  { %v2846_v23 = vpop.eup %2845 }
 0x2ce   :  { %2210 = vmatmul.mubr.f32.vlgmr.msra.gmra.mrb[14].mxu1 %v2846_v23 }
 0x2cf   :  { %2614 = vmatpush3.bf16.msra.mxu1 %v2954_v20  ;;  %2244 = vmatprep.mubr.msk.f32.mxu1 %vm2872_vm1, %v2873_v16 }
 0x2d0   :  { %2615 = vmatprep.subr.bf16.mxu1 %v2871_v24 }
 0x2d3   :  { %2617 = vmatpush3.bf16.msra.mxu1 %v2981_v31 }
 0x2d4   :  { %v2848_v14 = vpop.eup %2847  ;;  %2618 = vmatprep.subr.bf16.mxu1 %v2871_v24 }
 0x2d5   :  { %821 = vmatprep.mubr.f32.mxu0 %v2848_v14 }
 0x2d6   :  { %822 = vmatmul.mubr.f32.vlgmr.msra.gmra.mrb[20].mxu0 %v2846_v23 }
 0x2d7   :  { %2620 = vmatpush3.bf16.msra.mxu1 %v3009_v42  ;;  %2583 = vmatpush3.bf16.msra.mxu0 %v3214_v48 }
 0x2d8   :  { %2621 = vmatprep.subr.bf16.mxu1 %v2871_v24  ;;  %2585 = vmatprep.subr.bf16.mxu0 %v3216_v49 }
 0x2db   :  { %2623 = vmatpush3.bf16.msra.mxu1 %v3042_v54  ;;  %2587 = vmatpush3.bf16.msra.mxu0 %v3226_v52 }
 0x2dc   :  { %2624 = vmatprep.subr.bf16.mxu1 %v2871_v24  ;;  %2589 = vmatprep.subr.bf16.mxu0 %v3239_v57 }
 0x2df   :  { %2626 = vmatpush3.bf16.msra.mxu1 %v3072_v1  ;;  %2591 = vmatpush3.bf16.msra.mxu0 %v3244_v59 }
 0x2e0   :  { %2627 = vmatprep.subr.bf16.mxu1 %v2871_v24  ;;  %2593 = vmatprep.subr.bf16.mxu0 %v3254_v62 }
 0x2e3   :  { %2629 = vmatpush3.bf16.msra.mxu1 %v3096_v10  ;;  %2595 = vmatpush3.bf16.msra.mxu0 %v3262_v2 }
 0x2e4   :  { %2630 = vmatprep.subr.bf16.mxu1 %v2871_v24  ;;  %2597 = vmatprep.subr.bf16.mxu0 %v3272_v5 }
 0x2e7   :  { %2632 = vmatpush3.bf16.msra.mxu1 %v3114_v18  ;;  %2599 = vmatpush3.bf16.msra.mxu0 %v3280_v8 }
 0x2e8   :  { %2633 = vmatprep.subr.bf16.mxu1 %v2871_v24  ;;  %2601 = vmatprep.subr.bf16.mxu0 %v3290_v12 }
 0x2eb   :  { %2635 = vmatpush3.bf16.msra.mxu1 %v3130_v25  ;;  %2603 = vmatpush3.bf16.msra.mxu0 %v3298_v15 }
 0x2ec   :  { %2605 = vmatprep.subr.bf16.mxu0 %v3308_v21  ;;  %2668 = vmatprep.subr.bf16.mxu1 %v2871_v24 }
 0x2ef   :  { %2607 = vmatpush3.bf16.msra.mxu0 %v3316_v26 }
 0x2f0   :  { %2609 = vmatprep.subr.bf16.mxu0 %v3326_v29 }
 0x2f3   :  { %2611 = vmatpush3.bf16.msra.mxu0 %v3334_v33 }
 0x2f4   :  { %2637 = vmatprep.subr.bf16.mxu0 %v3203_v44 }
 0x3a1   :  { %v896_v28 = vpop.f32.mrb[14].mxu1 }
 0x3a2   :  { %v900_v30 = vadd.f32 %v896_v28, %v3348_v27  ;;  %v2211_v32 = vpop.f32.mrb[15].mxu1 }
 0x3a4   :  { %2849 = vtanh.f32 %v900_v30 }
 0x3a9   :  { %v1793_v35 = vpop.f32.mrb[20].mxu0 }
 0x3aa   :  { %v1794_v34 = vpop.f32.mrb[21].mxu0 }
 0x3ab   :  { %v1795_v37 = vadd.f32 %v1794_v34, %v1793_v35 }
 0x3ad   :  { %v824_v36 = vadd.f32 %v1795_v37, %v3397_v60 }
 0x3ae   :  { %v2850_v46 = vpop.eup %2849 }
 0x3af   :  { %2851 = vtanh.f32 %v824_v36  ;;  %2245 = vmatmul.mubr.f32.vlgmr.msra.gmra.mrb[16].mxu1 %v2850_v46 }
 0x3b0   :  { %2670 = vmatpush3.bf16.msra.mxu1 %v2954_v20  ;;  %2279 = vmatprep.mubr.msk.f32.mxu1 %vm2872_vm1, %v2873_v16 }
 0x3b1   :  { %2671 = vmatprep.subr.bf16.mxu1 %v2871_v24 }
 0x3b4   :  { %2673 = vmatpush3.bf16.msra.mxu1 %v2981_v31 }
 0x3b5   :  { %2674 = vmatprep.subr.bf16.mxu1 %v2871_v24 }
 0x3b8   :  { %2676 = vmatpush3.bf16.msra.mxu1 %v3009_v42 }
 0x3b9   :  { %v2852_v27 = vpop.eup %2851  ;;  %2677 = vmatprep.subr.bf16.mxu1 %v2871_v24 }
 0x3ba   :  { %966 = vmatprep.mubr.f32.mxu0 %v2852_v27 }
 0x3bb   :  { %967 = vmatmul.mubr.f32.vlgmr.msra.gmra.mrb[22].mxu0 %v2850_v46 }
 0x3bc   :  { %2679 = vmatpush3.bf16.msra.mxu1 %v3042_v54  ;;  %2639 = vmatpush3.bf16.msra.mxu0 %v3214_v48 }
 0x3bd   :  { %2680 = vmatprep.subr.bf16.mxu1 %v2871_v24  ;;  %2641 = vmatprep.subr.bf16.mxu0 %v3216_v49 }
 0x3c0   :  { %2682 = vmatpush3.bf16.msra.mxu1 %v3072_v1  ;;  %2643 = vmatpush3.bf16.msra.mxu0 %v3226_v52 }
 0x3c1   :  { %2683 = vmatprep.subr.bf16.mxu1 %v2871_v24  ;;  %2645 = vmatprep.subr.bf16.mxu0 %v3239_v57 }
 0x3c4   :  { %2685 = vmatpush3.bf16.msra.mxu1 %v3096_v10  ;;  %2647 = vmatpush3.bf16.msra.mxu0 %v3244_v59 }
 0x3c5   :  { %2686 = vmatprep.subr.bf16.mxu1 %v2871_v24  ;;  %2649 = vmatprep.subr.bf16.mxu0 %v3254_v62 }
 0x3c8   :  { %2688 = vmatpush3.bf16.msra.mxu1 %v3114_v18  ;;  %2651 = vmatpush3.bf16.msra.mxu0 %v3262_v2 }
 0x3c9   :  { %2689 = vmatprep.subr.bf16.mxu1 %v2871_v24  ;;  %2653 = vmatprep.subr.bf16.mxu0 %v3272_v5 }
 0x3cc   :  { %2691 = vmatpush3.bf16.msra.mxu1 %v3130_v25  ;;  %2655 = vmatpush3.bf16.msra.mxu0 %v3280_v8 }
 0x3cd   :  { %2657 = vmatprep.subr.bf16.mxu0 %v3290_v12  ;;  %2724 = vmatprep.subr.bf16.mxu1 %v2871_v24 }
 0x3d0   :  { %2659 = vmatpush3.bf16.msra.mxu0 %v3298_v15 }
 0x3d1   :  { %2661 = vmatprep.subr.bf16.mxu0 %v3308_v21 }
 0x3d4   :  { %2663 = vmatpush3.bf16.msra.mxu0 %v3316_v26 }
 0x3d5   :  { %2665 = vmatprep.subr.bf16.mxu0 %v3326_v29 }
 0x3d8   :  { %2667 = vmatpush3.bf16.msra.mxu0 %v3334_v33 }
 0x3d9   :  { %2693 = vmatprep.subr.bf16.mxu0 %v3203_v44 }
 0x482   :  { %v1041_v47 = vpop.f32.mrb[16].mxu1 }
 0x483   :  { %v1045_v39 = vadd.f32 %v1041_v47, %v3352_v43  ;;  %v2246_v51 = vpop.f32.mrb[17].mxu1 }
 0x485   :  { %2853 = vtanh.f32 %v1045_v39 }
 0x48e   :  { %v1845_v53 = vpop.f32.mrb[22].mxu0 }
 0x48f   :  { %v2854_v55 = vpop.eup %2853  ;;  %v1846_v38 = vpop.f32.mrb[23].mxu0 }
 0x490   :  { %v1847_v40 = vadd.f32 %v1846_v38, %v1845_v53  ;;  %2280 = vmatmul.mubr.f32.vlgmr.msra.gmra.mrb[18].mxu1 %v2854_v55 }
 0x491   :  { %2726 = vmatpush3.bf16.msra.mxu1 %v2954_v20  ;;  %2314 = vmatprep.mubr.msk.f32.mxu1 %vm2872_vm1, %v2873_v16 }
 0x492   :  { %v969_v41 = vadd.f32 %v1847_v40, %v3397_v60  ;;  %2727 = vmatprep.subr.bf16.mxu1 %v2871_v24 }
 0x494   :  { %2855 = vtanh.f32 %v969_v41 }
 0x495   :  { %2729 = vmatpush3.bf16.msra.mxu1 %v2981_v31 }
 0x496   :  { %2730 = vmatprep.subr.bf16.mxu1 %v2871_v24 }
 0x499   :  { %2732 = vmatpush3.bf16.msra.mxu1 %v3009_v42 }
 0x49a   :  { %2733 = vmatprep.subr.bf16.mxu1 %v2871_v24 }
 0x49d   :  { %2735 = vmatpush3.bf16.msra.mxu1 %v3042_v54 }
 0x49e   :  { %v2856_v43 = vpop.eup %2855  ;;  %2736 = vmatprep.subr.bf16.mxu1 %v2871_v24 }
 0x49f   :  { %1111 = vmatprep.mubr.f32.mxu0 %v2856_v43 }
 0x4a0   :  { %1112 = vmatmul.mubr.f32.vlgmr.msra.gmra.mrb[24].mxu0 %v2854_v55 }
 0x4a1   :  { %2738 = vmatpush3.bf16.msra.mxu1 %v3072_v1  ;;  %2695 = vmatpush3.bf16.msra.mxu0 %v3214_v48 }
 0x4a2   :  { %2739 = vmatprep.subr.bf16.mxu1 %v2871_v24  ;;  %2697 = vmatprep.subr.bf16.mxu0 %v3216_v49 }
 0x4a5   :  { %2741 = vmatpush3.bf16.msra.mxu1 %v3096_v10  ;;  %2699 = vmatpush3.bf16.msra.mxu0 %v3226_v52 }
 0x4a6   :  { %2742 = vmatprep.subr.bf16.mxu1 %v2871_v24  ;;  %2701 = vmatprep.subr.bf16.mxu0 %v3239_v57 }
 0x4a9   :  { %2744 = vmatpush3.bf16.msra.mxu1 %v3114_v18  ;;  %2703 = vmatpush3.bf16.msra.mxu0 %v3244_v59 }
 0x4aa   :  { %2745 = vmatprep.subr.bf16.mxu1 %v2871_v24  ;;  %2705 = vmatprep.subr.bf16.mxu0 %v3254_v62 }
 0x4ad   :  { %2747 = vmatpush3.bf16.msra.mxu1 %v3130_v25  ;;  %2707 = vmatpush3.bf16.msra.mxu0 %v3262_v2 }
 0x4ae   :  { %2709 = vmatprep.subr.bf16.mxu0 %v3272_v5  ;;  %2780 = vmatprep.subr.bf16.mxu1 %v2871_v24 }
 0x4b1   :  { %2711 = vmatpush3.bf16.msra.mxu0 %v3280_v8 }
 0x4b2   :  { %2713 = vmatprep.subr.bf16.mxu0 %v3290_v12 }
 0x4b5   :  { %2715 = vmatpush3.bf16.msra.mxu0 %v3298_v15 }
 0x4b6   :  { %2717 = vmatprep.subr.bf16.mxu0 %v3308_v21 }
 0x4b9   :  { %2719 = vmatpush3.bf16.msra.mxu0 %v3316_v26 }
 0x4ba   :  { %2721 = vmatprep.subr.bf16.mxu0 %v3326_v29 }
 0x4bd   :  { %2723 = vmatpush3.bf16.msra.mxu0 %v3334_v33 }
 0x4be   :  { %2749 = vmatprep.subr.bf16.mxu0 %v3203_v44 }
 0x563   :  { %v1186_v45 = vpop.f32.mrb[18].mxu1 }
 0x564   :  { %v1190_v61 = vadd.f32 %v1186_v45, %v3360_v50  ;;  %v2281_v63 = vpop.f32.mrb[19].mxu1 }
 0x566   :  { %2857 = vtanh.f32 %v1190_v61 }
 0x570   :  { %v2858_v0 = vpop.eup %2857 }
 0x571   :  { %2315 = vmatmul.mubr.f32.vlgmr.msra.gmra.mrb[20].mxu1 %v2858_v0 }
 0x572   :  { %2782 = vmatpush3.bf16.msra.mxu1 %v2954_v20  ;;  %2349 = vmatprep.mubr.msk.f32.mxu1 %vm2872_vm1, %v2873_v16 }
 0x573   :  { %v1897_v3 = vpop.f32.mrb[24].mxu0  ;;  %2783 = vmatprep.subr.bf16.mxu1 %v2871_v24 }
 0x574   :  { %v1898_v4 = vpop.f32.mrb[25].mxu0 }
 0x575   :  { %v1899_v6 = vadd.f32 %v1898_v4, %v1897_v3 }
 0x576   :  { %2785 = vmatpush3.bf16.msra.mxu1 %v2981_v31 }
 0x577   :  { %v1114_v7 = vadd.f32 %v1899_v6, %v3397_v60  ;;  %2786 = vmatprep.subr.bf16.mxu1 %v2871_v24 }
 0x579   :  { %2859 = vtanh.f32 %v1114_v7 }
 0x57a   :  { %2788 = vmatpush3.bf16.msra.mxu1 %v3009_v42 }
 0x57b   :  { %2789 = vmatprep.subr.bf16.mxu1 %v2871_v24 }
 0x57e   :  { %2791 = vmatpush3.bf16.msra.mxu1 %v3042_v54 }
 0x57f   :  { %2792 = vmatprep.subr.bf16.mxu1 %v2871_v24 }
 0x582   :  { %2794 = vmatpush3.bf16.msra.mxu1 %v3072_v1 }
 0x583   :  { %v2860_v20 = vpop.eup %2859  ;;  %2795 = vmatprep.subr.bf16.mxu1 %v2871_v24 }
 0x584   :  { %1256 = vmatprep.mubr.f32.mxu0 %v2860_v20 }
 0x585   :  { %1257 = vmatmul.mubr.f32.vlgmr.msra.gmra.mrb[26].mxu0 %v2858_v0 }
 0x586   :  { %2797 = vmatpush3.bf16.msra.mxu1 %v3096_v10  ;;  %2751 = vmatpush3.bf16.msra.mxu0 %v3214_v48 }
 0x587   :  { %2798 = vmatprep.subr.bf16.mxu1 %v2871_v24  ;;  %2753 = vmatprep.subr.bf16.mxu0 %v3216_v49 }
 0x58a   :  { %2800 = vmatpush3.bf16.msra.mxu1 %v3114_v18  ;;  %2755 = vmatpush3.bf16.msra.mxu0 %v3226_v52 }
 0x58b   :  { %2801 = vmatprep.subr.bf16.mxu1 %v2871_v24  ;;  %2757 = vmatprep.subr.bf16.mxu0 %v3239_v57 }
 0x58e   :  { %2803 = vmatpush3.bf16.msra.mxu1 %v3130_v25  ;;  %2759 = vmatpush3.bf16.msra.mxu0 %v3244_v59 }
 0x58f   :  { %2761 = vmatprep.subr.bf16.mxu0 %v3254_v62 }
 0x592   :  { %2763 = vmatpush3.bf16.msra.mxu0 %v3262_v2 }
 0x593   :  { %2765 = vmatprep.subr.bf16.mxu0 %v3272_v5 }
 0x596   :  { %2767 = vmatpush3.bf16.msra.mxu0 %v3280_v8 }
 0x597   :  { %2769 = vmatprep.subr.bf16.mxu0 %v3290_v12 }
 0x59a   :  { %2771 = vmatpush3.bf16.msra.mxu0 %v3298_v15 }
 0x59b   :  { %2773 = vmatprep.subr.bf16.mxu0 %v3308_v21 }
 0x59e   :  { %2775 = vmatpush3.bf16.msra.mxu0 %v3316_v26 }
 0x59f   :  { %2777 = vmatprep.subr.bf16.mxu0 %v3326_v29 }
 0x5a2   :  { %2779 = vmatpush3.bf16.msra.mxu0 %v3334_v33 }
 0x5a3   :  { %2805 = vmatprep.subr.bf16.mxu0 %v3203_v44 }
 0x644   :  { %v1331_v24 = vpop.f32.mrb[20].mxu1 }
 0x645   :  { %v1335_v31 = vadd.f32 %v1331_v24, %v3366_v56  ;;  %v2316_v42 = vpop.f32.mrb[21].mxu1 }
 0x647   :  { %2861 = vtanh.f32 %v1335_v31 }
 0x651   :  { %v2862_v54 = vpop.eup %2861 }
 0x652   :  { %2350 = vmatmul.mubr.f32.vlgmr.msra.gmra.mrb[22].mxu1 %v2862_v54 }
 0x658   :  { %v1949_v1 = vpop.f32.mrb[26].mxu0 }
 0x659   :  { %v1950_v10 = vpop.f32.mrb[27].mxu0 }
 0x65a   :  { %v1951_v16 = vadd.f32 %v1950_v10, %v1949_v1 }
 0x65c   :  { %v1259_v18 = vadd.f32 %v1951_v16, %v3397_v60 }
 0x65e   :  { %2863 = vtanh.f32 %v1259_v18 }
 0x668   :  { %v2864_v25 = vpop.eup %2863 }
 0x669   :  { %1401 = vmatprep.mubr.f32.mxu0 %v2864_v25 }
 0x66a   :  { %1402 = vmatmul.mubr.f32.vlgmr.msra.gmra.mrb[28].mxu0 %v2862_v54 }
 0x66b   :  { %2807 = vmatpush3.bf16.msra.mxu0 %v3214_v48 }
 0x66c   :  { %2809 = vmatprep.subr.bf16.mxu0 %v3216_v49 }
 0x66f   :  { %2811 = vmatpush3.bf16.msra.mxu0 %v3226_v52 }
 0x670   :  { %2813 = vmatprep.subr.bf16.mxu0 %v3239_v57 }
 0x673   :  { %2815 = vmatpush3.bf16.msra.mxu0 %v3244_v59 }
 0x674   :  { %2817 = vmatprep.subr.bf16.mxu0 %v3254_v62 }
 0x677   :  { %2819 = vmatpush3.bf16.msra.mxu0 %v3262_v2 }
 0x678   :  { %2821 = vmatprep.subr.bf16.mxu0 %v3272_v5 }
 0x67b   :  { %2823 = vmatpush3.bf16.msra.mxu0 %v3280_v8 }
 0x67c   :  { %2825 = vmatprep.subr.bf16.mxu0 %v3290_v12 }
 0x67f   :  { %2827 = vmatpush3.bf16.msra.mxu0 %v3298_v15 }
 0x680   :  { %2829 = vmatprep.subr.bf16.mxu0 %v3308_v21 }
 0x683   :  { %2831 = vmatpush3.bf16.msra.mxu0 %v3316_v26 }
 0x684   :  { %2833 = vmatprep.subr.bf16.mxu0 %v3326_v29 }
 0x687   :  { %2835 = vmatpush3.bf16.msra.mxu0 %v3334_v33 }
 0x725   :  { %v1476_v44 = vpop.f32.mrb[22].mxu1 }
 0x726   :  { %v1480_v48 = vadd.f32 %v1476_v44, %v3373_v58  ;;  %v2351_v49 = vpop.f32.mrb[23].mxu1 }
 0x73d   :  { %v2001_v52 = vpop.f32.mrb[28].mxu0 }
 0x73e   :  { %v2002_v57 = vpop.f32.mrb[29].mxu0 }
 0x73f   :  { %v2003_v59 = vadd.f32 %v2002_v57, %v2001_v52 }
 0x741   :  { %v1404_v62 = vadd.f32 %v2003_v59, %v3397_v60 }
 0x743   :  { %2865 = vtanh.f32 %v1404_v62 }
 0x744   :  { %2867 = vtanh.f32 %v1480_v48 }
 0x74d   :  { %v2866_v2 = vpop.eup %2865 }
 0x74e   :  { %v2868_v5 = vpop.eup %2867  ;;  %1546 = vmatprep.mubr.f32.mxu0 %v2866_v2 }
 0x74f   :  { %1547 = vmatmul.mubr.f32.vlgmr.msra.gmra.mrb[30].mxu0 %v2868_v5 }
 0x822   :  { %v2053_v8 = vpop.f32.mrb[30].mxu0 }
 0x823   :  { %v2054_v12 = vpop.f32.mrb[31].mxu0 }
 0x824   :  { %v2055_v15 = vadd.f32 %v2054_v12, %v2053_v8 }
 0x826   :  { %v1549_v21 = vadd.f32 %v2055_v15, %v3397_v60 }
 0x828   :  { %2869 = vtanh.f32 %v1549_v21 }
 0x832   :  { %v2870_v26 = vpop.eup %2869 }
 0x833   :  { %1559 = vst [vmem:[%s3606_s6] sm:$0xff] %v2870_v26 }

</bundles_post_ra>
